<compile_context>
chip_gen: v7x
topology: tpu7x:2x2x1
jax: 0.10.0
libtpu: 0.0.40
codegen_flags: <defaults>
</compile_context>

<pallas_src>
import jax
import jax.numpy as jnp
from jax.experimental import pallas as pl
from jax.experimental.pallas import tpu as pltpu
from jax.scipy.linalg import block_diag


def _round_up(n: int, m: int) -> int:
    return ((n + m - 1) // m) * m


def fold_factor(latent_dim: int) -> int:
    """How many batch rows to fold into the 128-lane axis."""
    if latent_dim < 128 and 128 % latent_dim == 0:
        return 128 // latent_dim
    return 1


# ----------------------------- kernel -----------------------------------------


def _disc_kernel(x_ref, w1_ref, b1_ref, w2_ref, b2_ref, out_ref):
    # Layer 1 on the MXU. x arrives as f32 from HBM; the bf16 cast happens here on the
    # VPU (free under the MXU) instead of as a separate wrapper-side XLA pass.
    x = x_ref[...].astype(jnp.bfloat16)
    h = jnp.dot(x, w1_ref[...], preferred_element_type=jnp.float32)
    h = h + b1_ref[...]                          # f32 bias add
    h = jnp.where(h > 0, h, 0.2 * h)             # LeakyReLU(0.2) on the VPU
    # Layer 2 on the MXU. The block-diagonal folded w2 keeps folded rows independent.
    o = jnp.dot(h.astype(jnp.bfloat16), w2_ref[...], preferred_element_type=jnp.float32)
    o = o + b2_ref[...]
    # Sigmoid: exp on the EUP + approximate reciprocal (EUP vrcp slot).
    out_ref[...] = pl.reciprocal(1.0 + jnp.exp(-o), approx=True).astype(out_ref.dtype)


# ----------------------------- one-time weight prep ----------------------------


def prepare_discriminator_params(w1, b1, w2, b2, fold: int):
    """Pack weights once at init (hoisted out of the forward pass).

    w1: (D, H), b1: (H,), w2: (H, O), b2: (O,)  ->  folded block-diagonal, lane-padded,
    bf16 weights / f32 biases for the kernel.
    """
    D, H = w1.shape
    O = w2.shape[1]
    F = fold
    Hf = F * H
    HfP = _round_up(max(Hf, 128), 128)           # lane-dense hidden width

    w1f = block_diag(*([w1] * F))                                  # (F*D, F*H)
    w1f = jnp.pad(w1f, ((0, 0), (0, HfP - Hf))).astype(jnp.bfloat16)
    b1f = jnp.pad(jnp.tile(b1, F), (0, HfP - Hf)).reshape(1, HfP).astype(jnp.float32)
    w2f = block_diag(*([w2] * F))                                  # (F*H, F*O)
    w2f = jnp.pad(w2f, ((0, HfP - Hf), (0, 0))).astype(jnp.bfloat16)
    b2f = jnp.tile(b2, F).reshape(1, F * O).astype(jnp.float32)
    return w1f, b1f, w2f, b2f


# ----------------------------- tiling heuristic --------------------------------


def _choose_tiling(n_rows: int, row_bytes: int):
    """Pick (tile_rows, grid_steps) along the folded batch axis."""
    # Keep each double-buffered x block around <= 4 MiB; cap the tile absolutely too.
    vmem_rows = max(8, (4 * 1024 * 1024) // max(row_bytes, 1))
    max_tile = max(8, min(4096, (vmem_rows // 8) * 8))
    if n_rows <= max_tile and n_rows < 1024:
        # Small batch: one full-extent block (grid=1); per-step overhead dominates
        # otherwise, and a full-dim block is exempt from the 8-row constraint.
        return n_rows, 1
    # Large batch: >= 2 steps so megacore (v7x) has real work on both cores; the last
    # block may be ragged (OOB output rows are dropped, rows never mix).
    n_steps = max(2, pl.cdiv(n_rows, max_tile))
    tile = _round_up(pl.cdiv(n_rows, n_steps), 8)
    return tile, pl.cdiv(n_rows, tile)


# ----------------------------- forward -----------------------------------------


@jax.jit
def discriminator_forward(x, w1f, b1f, w2f, b2f):
    """x: (B, D) f32.  w1f/b1f/w2f/b2f: prepared by prepare_discriminator_params."""
    B, D = x.shape
    FD, HfP = w1f.shape
    FO = w2f.shape[1]
    F = FD // D
    O = FO // F

    # Fold F batch rows into the 128-lane axis. For contiguous x this reshape is free;
    # a pad only happens when B is not a multiple of F (not the case for typical B).
    Bpad = _round_up(B, F)
    if Bpad != B:
        x = jnp.pad(x, ((0, Bpad - B), (0, 0)))
    Bf = Bpad // F
    xf = x.reshape(Bf, FD)                       # stays f32; cast to bf16 in-kernel

    tile_bf, n_steps = _choose_tiling(Bf, FD * 4)

    cost = pl.CostEstimate(
        flops=2 * Bf * (FD * HfP + HfP * FO),
        transcendentals=2 * Bf * FO,
        bytes_accessed=(xf.size * 4 + w1f.size * 2 + w2f.size * 2
                        + b1f.size * 4 + b2f.size * 4 + Bf * FO * 4),
    )

    const = lambda i: (0, 0)
    out = pl.pallas_call(
        _disc_kernel,
        out_shape=jax.ShapeDtypeStruct((Bf, FO), jnp.float32),
        grid=(n_steps,),
        in_specs=[
            pl.BlockSpec((tile_bf, FD), lambda i: (i, 0)),   # streamed f32 x, dbl-buffered
            pl.BlockSpec((FD, HfP), const),                  # resident bf16 w1 (block-diag)
            pl.BlockSpec((1, HfP), const),                   # resident f32 b1
            pl.BlockSpec((HfP, FO), const),                  # resident bf16 w2 (block-diag)
            pl.BlockSpec((1, FO), const),                    # resident f32 b2
        ],
        out_specs=pl.BlockSpec((tile_bf, FO), lambda i: (i, 0)),
        compiler_params=pltpu.CompilerParams(
            dimension_semantics=("parallel",),               # megacore sharding on v7x
            vmem_limit_bytes=32 * 1024 * 1024,               # ample for these tile sizes
        ),
        cost_estimate=cost,
    )(xf, w1f, b1f, w2f, b2f)

    # (Bf, F*O) -> (Bpad, O); folded row r, chunk j corresponds to original row r*F + j.
    return out.reshape(Bpad, O)[:B]


# ----------------------------- init / references -------------------------------


def init_params(key, latent_dim, struct):
    """PyTorch nn.Linear-style init; weights returned in (in, out) layout."""
    k1, k2, k3, k4 = jax.random.split(key, 4)
    h, out = struct
    lim1 = 1.0 / jnp.sqrt(latent_dim)
    w1_pt = jax.random.uniform(k1, (h, latent_dim), jnp.float32, -lim1, lim1)
    b1 = jax.random.uniform(k2, (h,), jnp.float32, -lim1, lim1)
    lim2 = 1.0 / jnp.sqrt(h)
    w2_pt = jax.random.uniform(k3, (out, h), jnp.float32, -lim2, lim2)
    b2 = jax.random.uniform(k4, (out,), jnp.float32, -lim2, lim2)
    return w1_pt.T, b1, w2_pt.T, b2


def reference_forward(x, w1, b1, w2, b2):
    hi = jax.lax.Precision.HIGHEST
    h = jnp.dot(x, w1, precision=hi) + b1
    h = jnp.where(h > 0, h, 0.2 * h)
    o = jnp.dot(h, w2, precision=hi) + b2
    return 1.0 / (1.0 + jnp.exp(-o))


def matched_reference(x, w1, b1, w2, b2):
    """Reference with the kernel's bf16 rounding of the MXU operands."""
    hi = jax.lax.Precision.HIGHEST
    q = lambda a: a.astype(jnp.bfloat16).astype(jnp.float32)
    h = jnp.dot(q(x), q(w1), precision=hi) + b1
    h = jnp.where(h > 0, h, 0.2 * h)
    o = jnp.dot(q(h), q(w2), precision=hi) + b2
    return 1.0 / (1.0 + jnp.exp(-o))


# ----------------------------- main ---------------------------------------------


if __name__ == "__main__":
    # Synthetic config (opt.latent_dim, opt.dis_struct):
    latent_dim = 32
    struct = [64, 1]

    key = jax.random.PRNGKey(0)
    kx, kx2, kp = jax.random.split(key, 3)
    w1, b1, w2, b2 = init_params(kp, latent_dim, struct)

    F = fold_factor(latent_dim)                                   # 4 for latent_dim=32
    packed = prepare_discriminator_params(w1, b1, w2, b2, F)      # one-time weight prep

    # Small batch: single full-extent block (grid=1), no padding (600 % 4 == 0).
    x = jax.random.normal(kx, (600, latent_dim), jnp.float32)
    out = jax.block_until_ready(discriminator_forward(x, *packed))
    assert out.shape == (600, struct[1])
    assert bool(jnp.allclose(out, matched_reference(x, w1, b1, w2, b2), atol=2e-3))
    assert bool(jnp.allclose(out, reference_forward(x, w1, b1, w2, b2), atol=1.5e-2))

    # Larger, non-multiple batch: exercises the fold pad + 2-step ragged grid path.
    x2 = jax.random.normal(kx2, (4801, latent_dim), jnp.float32)
    out2 = jax.block_until_ready(discriminator_forward(x2, *packed))
    assert out2.shape == (4801, struct[1])
    assert bool(jnp.allclose(out2, matched_reference(x2, w1, b1, w2, b2), atol=2e-3))
    assert bool(jnp.allclose(out2, reference_forward(x2, w1, b1, w2, b2), atol=1.5e-2))

    print("KERNEL_OK")
</pallas_src>

<mosaic_0001>
module attributes {stable_mosaic.version = 11 : i64} {
  func.func @_disc_kernel(%arg0: i32, %arg1: memref<150x128xf32, #tpu.memory_space<vmem>>, %arg2: memref<128x256xbf16, #tpu.memory_space<vmem>>, %arg3: memref<1x256xf32, #tpu.memory_space<vmem>>, %arg4: memref<256x4xbf16, #tpu.memory_space<vmem>>, %arg5: memref<1x4xf32, #tpu.memory_space<vmem>>, %arg6: memref<150x4xf32, #tpu.memory_space<vmem>>) attributes {dimension_semantics = [#tpu.dimension_semantics<parallel>], iteration_bounds = array<i64: 1>, scalar_prefetch = 0 : i64, scratch_operands = 0 : i64, tpu.core_type = #tpu.core_type<tc>, window_params = [{transform_indices = @transform_0, window_bounds = array<i64: 150, 128>}, {pipeline_mode = #tpu.pipeline_mode<synchronous>, transform_indices = @transform_1, window_bounds = array<i64: 128, 256>}, {pipeline_mode = #tpu.pipeline_mode<synchronous>, transform_indices = @transform_2, window_bounds = array<i64: 1, 256>}, {pipeline_mode = #tpu.pipeline_mode<synchronous>, transform_indices = @transform_3, window_bounds = array<i64: 256, 4>}, {pipeline_mode = #tpu.pipeline_mode<synchronous>, transform_indices = @transform_4, window_bounds = array<i64: 1, 4>}, {transform_indices = @transform_5, window_bounds = array<i64: 150, 4>}]} {
    %c0 = arith.constant 0 : index
    %c0_0 = arith.constant 0 : index
    %0 = vector.load %arg1[%c0, %c0_0] : memref<150x128xf32, #tpu.memory_space<vmem>>, vector<150x128xf32>
    %1 = arith.truncf %0 : vector<150x128xf32> to vector<150x128xbf16>
    %c0_1 = arith.constant 0 : index
    %c0_2 = arith.constant 0 : index
    %2 = vector.load %arg2[%c0_1, %c0_2] : memref<128x256xbf16, #tpu.memory_space<vmem>>, vector<128x256xbf16>
    %cst = arith.constant dense<0.000000e+00> : vector<150x256xf32>
    %3 = tpu.matmul %1, %2, %cst {dimension_numbers = #tpu.dot_dimension_numbers<[1], [0], [0], [1], [0, 0, 1, 1], [], []>} : vector<150x128xbf16>, vector<128x256xbf16>, vector<150x256xf32> -> vector<150x256xf32>
    %c0_3 = arith.constant 0 : index
    %c0_4 = arith.constant 0 : index
    %4 = vector.load %arg3[%c0_3, %c0_4] : memref<1x256xf32, #tpu.memory_space<vmem>>, vector<1x256xf32>
    %5 = vector.broadcast %4 : vector<1x256xf32> to vector<150x256xf32>
    %6 = arith.addf %3, %5 : vector<150x256xf32>
    %cst_5 = arith.constant 0.000000e+00 : f32
    %7 = vector.broadcast %cst_5 : f32 to vector<150x256xf32>
    %8 = arith.cmpf ogt, %6, %7 : vector<150x256xf32>
    %cst_6 = arith.constant 2.000000e-01 : f32
    %9 = vector.broadcast %cst_6 : f32 to vector<150x256xf32>
    %10 = arith.mulf %9, %6 : vector<150x256xf32>
    %11 = arith.select %8, %6, %10 : vector<150x256xi1>, vector<150x256xf32>
    %12 = arith.truncf %11 : vector<150x256xf32> to vector<150x256xbf16>
    %c0_7 = arith.constant 0 : index
    %c0_8 = arith.constant 0 : index
    %13 = vector.load %arg4[%c0_7, %c0_8] : memref<256x4xbf16, #tpu.memory_space<vmem>>, vector<256x4xbf16>
    %cst_9 = arith.constant dense<0.000000e+00> : vector<150x4xf32>
    %14 = tpu.matmul %12, %13, %cst_9 {dimension_numbers = #tpu.dot_dimension_numbers<[1], [0], [0], [1], [0, 0, 1, 1], [], []>} : vector<150x256xbf16>, vector<256x4xbf16>, vector<150x4xf32> -> vector<150x4xf32>
    %c0_10 = arith.constant 0 : index
    %c0_11 = arith.constant 0 : index
    %15 = vector.load %arg5[%c0_10, %c0_11] : memref<1x4xf32, #tpu.memory_space<vmem>>, vector<1x4xf32>
    %16 = vector.broadcast %15 : vector<1x4xf32> to vector<150x4xf32>
    %17 = arith.addf %14, %16 : vector<150x4xf32>
    %cst_12 = arith.constant 0.000000e+00 : f32
    %18 = vector.broadcast %cst_12 : f32 to vector<150x4xf32>
    %19 = arith.subf %18, %17 : vector<150x4xf32>
    %20 = math.exp %19 : vector<150x4xf32>
    %cst_13 = arith.constant 1.000000e+00 : f32
    %21 = vector.broadcast %cst_13 : f32 to vector<150x4xf32>
    %22 = arith.addf %21, %20 : vector<150x4xf32>
    %23 = tpu.reciprocal %22 {approx = true} : vector<150x4xf32> -> vector<150x4xf32>
    %c0_14 = arith.constant 0 : index
    %c0_15 = arith.constant 0 : index
    %24 = vector.load %arg6[%c0_14, %c0_15] : memref<150x4xf32, #tpu.memory_space<vmem>>, vector<150x4xf32>
    tpu.vector_store %arg6[%c0_14, %c0_15], %23 {strides = array<i32>} : memref<150x4xf32, #tpu.memory_space<vmem>>, vector<150x4xf32>,
    return
  }
  func.func @transform_0(%arg0: i32) -> (i32, i32) {
    %c0_i32 = arith.constant 0 : i32
    %c0_i32_0 = arith.constant 0 : i32
    return %arg0, %c0_i32 : i32, i32
  }
  func.func @transform_1(%arg0: i32) -> (i32, i32) {
    %c0_i32 = arith.constant 0 : i32
    %c0_i32_0 = arith.constant 0 : i32
    %c0_i32_1 = arith.constant 0 : i32
    return %c0_i32, %c0_i32_0 : i32, i32
  }
  func.func @transform_2(%arg0: i32) -> (i32, i32) {
    %c0_i32 = arith.constant 0 : i32
    %c0_i32_0 = arith.constant 0 : i32
    %c0_i32_1 = arith.constant 0 : i32
    return %c0_i32, %c0_i32_0 : i32, i32
  }
  func.func @transform_3(%arg0: i32) -> (i32, i32) {
    %c0_i32 = arith.constant 0 : i32
    %c0_i32_0 = arith.constant 0 : i32
    %c0_i32_1 = arith.constant 0 : i32
    return %c0_i32, %c0_i32_0 : i32, i32
  }
  func.func @transform_4(%arg0: i32) -> (i32, i32) {
    %c0_i32 = arith.constant 0 : i32
    %c0_i32_0 = arith.constant 0 : i32
    %c0_i32_1 = arith.constant 0 : i32
    return %c0_i32, %c0_i32_0 : i32, i32
  }
  func.func @transform_5(%arg0: i32) -> (i32, i32) {
    %c0_i32 = arith.constant 0 : i32
    %c0_i32_0 = arith.constant 0 : i32
    return %arg0, %c0_i32 : i32, i32
  }
}

</mosaic_0001>

<bundles_post_ra>
// kernel: discriminator_forward.1
= control target key start
LH: loop header
LB: loop body
LE: loop exit
PB: predicated region body
PF: predicated region fallthrough
CT: control target
= control target key end

     0   :  { %v1016_v1 = vmov 0   ;;  %v68_v62 = vlaneseq  ;;  %s1354_s1 = inlined_call_operand.vmem [shape: bf16[128,256], index: 1, kind: input, shape index: {}]   ;;  %s1355_s3 = inlined_call_operand.vmem [shape: bf16[256,4], index: 3, kind: input, shape index: {}]   ;;  %s1356_s0 = inlined_call_operand.vmem [shape: f32[150,128], index: 0, kind: input, shape index: {}]   ;;  %s1357_s2 = inlined_call_operand.vmem [shape: f32[1,256], index: 2, kind: input, shape index: {}]   ;;  %s1358_s4 = inlined_call_operand.vmem [shape: f32[1,4], index: 4, kind: input, shape index: {}]   ;;  %s1359_s5 = inlined_call_operand.vmem [shape: f32[150,4], index: 5, kind: output, shape index: {}]  }
   0x1   :  { %v900_v0 = vld [vmem:[%s1354_s1 + $0x4] ss:$8 sps:$4 sm:$0xff]   ;;  %190 = vmatprep.mubr.bf16.mxu0 %v1016_v1  ;;  %v902_v2 = vld [vmem:[%s1354_s1] ss:$8 sps:$4 sm:$0xff]   ;;  %v903_v3 = vld [vmem:[%s1354_s1 + $0x14] ss:$8 sps:$4 sm:$0xff]  }
   0x2   :  { %158 = vmatprep.subr.bf16.mxu0 %v900_v0  ;;  %v905_v4 = vld [vmem:[%s1354_s1 + $0x10] ss:$8 sps:$4 sm:$0xff]   ;;  %v906_v5 = vld [vmem:[%s1354_s1 + $0x24] ss:$8 sps:$4 sm:$0xff]   ;;  %v908_v6 = vld [vmem:[%s1354_s1 + $0x20] ss:$8 sps:$4 sm:$0xff]  }
   0x3   :  { %159 = vmatpush1.bf16.msra.mxu0 %v902_v2  ;;  %v909_v7 = vld [vmem:[%s1354_s1 + $0x34] ss:$8 sps:$4 sm:$0xff]   ;;  %v911_v8 = vld [vmem:[%s1354_s1 + $0x30] ss:$8 sps:$4 sm:$0xff]   ;;  %v912_v9 = vld [vmem:[%s1354_s1 + $0x44] ss:$8 sps:$4 sm:$0xff]  }
   0x4   :  { %160 = vmatprep.subr.bf16.mxu0 %v903_v3  ;;  %v914_v10 = vld [vmem:[%s1354_s1 + $0x40] ss:$8 sps:$4 sm:$0xff]   ;;  %v915_v11 = vld [vmem:[%s1354_s1 + $0x54] ss:$8 sps:$4 sm:$0xff]   ;;  %v917_v12 = vld [vmem:[%s1354_s1 + $0x50] ss:$8 sps:$4 sm:$0xff]  }
   0x5   :  { %v924_v13 = vld [vmem:[%s1355_s3 + $0x40] sm:$0xff]   ;;  %v926_v16 = vld [vmem:[%s1355_s3 + $0x48] sm:$0xff]   ;;  %v928_v18 = vld [vmem:[%s1355_s3 + $0x50] sm:$0xff]   ;;  %v69_v63 = vshrl.u32 %v68_v62, 7 }
   0x6   :  { %v918_v14 = vld [vmem:[%s1354_s1 + $0x64] ss:$8 sps:$4 sm:$0xff]   ;;  %823 = vmatprep.subr.bf16.mxu1 %v924_v13  ;;  %v920_v19 = vld [vmem:[%s1354_s1 + $0x60] ss:$8 sps:$4 sm:$0xff]   ;;  %v921_v20 = vld [vmem:[%s1354_s1 + $0x74] ss:$8 sps:$4 sm:$0xff]  }
   0x7   :  { %161 = vmatpush1.bf16.msra.mxu0 %v905_v4  ;;  %v925_v15 = vld [vmem:[%s1355_s3] sm:$0xff]   ;;  %v927_v17 = vld [vmem:[%s1355_s3 + $0x8] sm:$0xff]   ;;  %v929_v21 = vld [vmem:[%s1355_s3 + $0x10] sm:$0xff]   ;;  %v70_v0 = vsub.s32 0, %v69_v63  ;;  %v74_v2 = vsub.s32 1, %v69_v63 }
   0x8   :  { %162 = vmatprep.subr.bf16.mxu0 %v906_v5  ;;  %824 = vmatpush3.bf16.msra.mxu1 %v925_v15  ;;  %v923_v22 = vld [vmem:[%s1354_s1 + $0x70] ss:$8 sps:$4 sm:$0xff]   ;;  %v21_v23 = vld [vmem:[%s1356_s0] sm:$0xff]  ;;  %v22_v24 = vld [vmem:[%s1356_s0 + $0x8] sm:$0xff] }
   0x9   :  { %825 = vmatprep.subr.bf16.mxu1 %v926_v16  ;;  %v930_v25 = vld [vmem:[%s1355_s3 + $0x58] sm:$0xff]   ;;  %v932_v27 = vld [vmem:[%s1355_s3 + $0x60] sm:$0xff]   ;;  %v40_v28 = vpack.c.bf16 %v22_v24, %v21_v23  ;;  %v23_v30 = vld [vmem:[%s1356_s0 + $0x10] sm:$0xff] }
   0xa   :  { %v931_v26 = vld [vmem:[%s1355_s3 + $0x18] sm:$0xff]   ;;  %v933_v29 = vld [vmem:[%s1355_s3 + $0x20] sm:$0xff]   ;;  %v26_v34 = vld [vmem:[%s1356_s0 + $0x28] sm:$0xff] }
   0xb   :  { %163 = vmatpush1.bf16.msra.mxu0 %v908_v6  ;;  %v24_v31 = vld [vmem:[%s1356_s0 + $0x18] sm:$0xff]  ;;  %v25_v33 = vld [vmem:[%s1356_s0 + $0x20] sm:$0xff]  ;;  %v27_v36 = vld [vmem:[%s1356_s0 + $0x30] sm:$0xff] }
   0xc   :  { %164 = vmatprep.subr.bf16.mxu0 %v909_v7  ;;  %826 = vmatpush3.bf16.msra.mxu1 %v927_v17  ;;  %v41_v32 = vpack.c.bf16 %v24_v31, %v23_v30  ;;  %v42_v35 = vpack.c.bf16 %v26_v34, %v25_v33  ;;  %v28_v37 = vld [vmem:[%s1356_s0 + $0x38] sm:$0xff]  ;;  %v29_v39 = vld [vmem:[%s1356_s0 + $0x40] sm:$0xff]  ;;  %v30_v40 = vld [vmem:[%s1356_s0 + $0x48] sm:$0xff] }
   0xd   :  { %827 = vmatprep.subr.bf16.mxu1 %v928_v18  ;;  %v43_v38 = vpack.c.bf16 %v28_v37, %v27_v36  ;;  %v44_v41 = vpack.c.bf16 %v30_v40, %v29_v39  ;;  %v31_v42 = vld [vmem:[%s1356_s0 + $0x50] sm:$0xff]  ;;  %v32_v43 = vld [vmem:[%s1356_s0 + $0x58] sm:$0xff]  ;;  %v33_v45 = vld [vmem:[%s1356_s0 + $0x60] sm:$0xff] }
   0xe   :  { %v45_v44 = vpack.c.bf16 %v32_v43, %v31_v42  ;;  %v34_v46 = vld [vmem:[%s1356_s0 + $0x68] sm:$0xff]  ;;  %v35_v48 = vld [vmem:[%s1356_s0 + $0x70] sm:$0xff]  ;;  %v36_v49 = vld [vmem:[%s1356_s0 + $0x78] sm:$0xff] }
   0xf   :  { %165 = vmatpush1.bf16.msra.mxu0 %v911_v8  ;;  %v46_v47 = vpack.c.bf16 %v34_v46, %v33_v45  ;;  %v47_v50 = vpack.c.bf16 %v36_v49, %v35_v48  ;;  %v37_v51 = vld [vmem:[%s1356_s0 + $0x80] sm:$0xff]  ;;  %v38_v52 = vld [vmem:[%s1356_s0 + $0x88] sm:$0xff]  ;;  %v39_v54 = vld [vmem:[%s1356_s0 + $0x90] sm:$0x3f] }
  0x10   :  { %166 = vmatprep.subr.bf16.mxu0 %v912_v9  ;;  %828 = vmatpush3.bf16.msra.mxu1 %v929_v21  ;;  %v48_v53 = vpack.c.bf16 %v38_v52, %v37_v51  ;;  %v49_v55 = vpack.c.bf16 %v39_v54, %v39_v54  ;;  %v934_v56 = vld [vmem:[%s1355_s3 + $0x68] sm:$0xff]   ;;  %v936_v58 = vld [vmem:[%s1355_s3 + $0x70] sm:$0xff]   ;;  %v938_v60 = vld [vmem:[%s1355_s3 + $0x78] sm:$0xff]  }
  0x11   :  { %829 = vmatprep.subr.bf16.mxu1 %v930_v25  ;;  %v935_v57 = vld [vmem:[%s1355_s3 + $0x28] sm:$0xff]   ;;  %v937_v59 = vld [vmem:[%s1355_s3 + $0x30] sm:$0xff]   ;;  %v939_v61 = vld [vmem:[%s1355_s3 + $0x38] sm:$0xff]  }
  0x13   :  { %167 = vmatpush1.bf16.msra.mxu0 %v914_v10 }
  0x14   :  { %168 = vmatprep.subr.bf16.mxu0 %v915_v11  ;;  %830 = vmatpush3.bf16.msra.mxu1 %v931_v26 }
  0x15   :  { %831 = vmatprep.subr.bf16.mxu1 %v932_v27 }
  0x17   :  { %169 = vmatpush1.bf16.msra.mxu0 %v917_v12 }
  0x18   :  { %170 = vmatprep.subr.bf16.mxu0 %v918_v14  ;;  %832 = vmatpush3.bf16.msra.mxu1 %v933_v29 }
  0x19   :  { %833 = vmatprep.subr.bf16.mxu1 %v934_v56 }
  0x1b   :  { %171 = vmatpush1.bf16.msra.mxu0 %v920_v19 }
  0x1c   :  { %172 = vmatprep.subr.bf16.mxu0 %v921_v20  ;;  %834 = vmatpush3.bf16.msra.mxu1 %v935_v57 }
  0x1d   :  { %835 = vmatprep.subr.bf16.mxu1 %v936_v58 }
  0x1f   :  { %173 = vmatpush1.bf16.msra.mxu0 %v923_v22 }
  0x20   :  { %836 = vmatpush3.bf16.msra.mxu1 %v937_v59 }
  0x21   :  { %837 = vmatprep.subr.bf16.mxu1 %v938_v60 }
  0x22   :  { %191 = vmatmul.mubr.bf16.vlgmr.msra.gmra.mrb[0].mxu0 %v40_v28 }
  0x23   :  { %200 = vmatprep.mubr.bf16.mxu0 %v1016_v1 }
  0x24   :  { %838 = vmatpush3.bf16.msra.mxu1 %v939_v61 }
  0x2a   :  { %201 = vmatmul.mubr.bf16.gmra.mrb[4].mxu0 %v41_v32 }
  0x2b   :  { %210 = vmatprep.mubr.bf16.mxu0 %v1016_v1 }
  0x32   :  { %211 = vmatmul.mubr.bf16.gmra.mrb[8].mxu0 %v42_v35 }
  0x33   :  { %220 = vmatprep.mubr.bf16.mxu0 %v1016_v1 }
  0x3a   :  { %221 = vmatmul.mubr.bf16.gmra.mrb[12].mxu0 %v43_v38 }
  0x3b   :  { %230 = vmatprep.mubr.bf16.mxu0 %v1016_v1 }
  0x42   :  { %231 = vmatmul.mubr.bf16.gmra.mrb[16].mxu0 %v44_v41 }
  0x43   :  { %240 = vmatprep.mubr.bf16.mxu0 %v1016_v1 }
  0x4a   :  { %241 = vmatmul.mubr.bf16.gmra.mrb[20].mxu0 %v45_v44 }
  0x4b   :  { %250 = vmatprep.mubr.bf16.mxu0 %v1016_v1 }
  0x52   :  { %251 = vmatmul.mubr.bf16.gmra.mrb[24].mxu0 %v46_v47 }
  0x53   :  { %260 = vmatprep.mubr.bf16.mxu0 %v1016_v1 }
  0x5a   :  { %261 = vmatmul.mubr.bf16.gmra.mrb[28].mxu0 %v47_v50 }
  0x5b   :  { %270 = vmatprep.mubr.bf16.mxu0 %v1016_v1 }
  0x62   :  { %271 = vmatmul.mubr.bf16.gmra.mrb[32].mxu0 %v48_v53 }
  0x63   :  { %280 = vmatprep.mubr.bf16.mxu0 %v1016_v1  ;;  %v66_v1 = vld [vmem:[%s1357_s2] sm:$0x3] }
  0x64   :  { %v1213_v3 = vrot.slane %v66_v1, %v70_v0  ;;  %v1215_v4 = vrot.slane %v66_v1, %v74_v2 }
  0x6a   :  { %281 = vmatmul.mubr.bf16.gmra.mrb[36].mxu0 %v49_v55 }
  0xf5   :  { %v192_v5 = vpop.f32.mrb[0].mxu0 }
  0xf6   :  { %v193_v6 = vadd.f32 %v192_v5, %v1213_v3  ;;  %v194_v7 = vpop.f32.mrb[1].mxu0 }
  0xf7   :  { %v195_v8 = vadd.f32 %v194_v7, %v1215_v4  ;;  %v196_v9 = vpop.f32.mrb[2].mxu0 }
  0xf8   :  { %v327_v10 = vmul.f32 0.2, %v193_v6  ;;  %v197_v11 = vadd.f32 %v196_v9, %v1213_v3  ;;  %v198_v12 = vpop.f32.mrb[3].mxu0  ;;  %vm289_vm0 = vcmp.gt.f32.partialorder %v193_v6, 0.0 }
  0xf9   :  { %v328_v13 = vmul.f32 0.2, %v195_v8  ;;  %v199_v14 = vadd.f32 %v198_v12, %v1215_v4  ;;  %vm290_vm2 = vcmp.gt.f32.partialorder %v195_v8, 0.0 }
  0xfa   :  { %vm291_vm1 = vcmp.gt.f32.partialorder %v197_v11, 0.0  ;;  %v329_v15 = vmul.f32 0.2, %v197_v11  ;;  %v365_v17 = vsel %vm289_vm0, %v193_v6, %v327_v10 }
  0xfb   :  { %v330_v16 = vmul.f32 0.2, %v199_v14  ;;  %vm292_vm3 = vcmp.gt.f32.partialorder %v199_v14, 0.0  ;;  %v366_v20 = vsel %vm290_vm2, %v195_v8, %v328_v13 }
  0xfc   :  { %v367_v18 = vsel %vm291_vm1, %v197_v11, %v329_v15 }
  0xfd   :  { %v202_v19 = vpop.f32.mrb[4].mxu0  ;;  %v368_v21 = vsel %vm292_vm3, %v199_v14, %v330_v16  ;;  %v403_v22 = vpack.c.bf16 %v367_v18, %v365_v17 }
  0xfe   :  { %v203_v23 = vadd.f32 %v202_v19, %v1213_v3  ;;  %v204_v24 = vpop.f32.mrb[5].mxu0  ;;  %v404_v25 = vpack.c.bf16 %v368_v21, %v366_v20 }
  0xff   :  { %v205_v26 = vadd.f32 %v204_v24, %v1215_v4  ;;  %v206_v27 = vpop.f32.mrb[6].mxu0 }
 0x100   :  { %v331_v28 = vmul.f32 0.2, %v203_v23  ;;  %v207_v29 = vadd.f32 %v206_v27, %v1213_v3  ;;  %v208_v30 = vpop.f32.mrb[7].mxu0  ;;  %590 = vmatprep.mubr.bf16.mxu1 %v404_v25  ;;  %vm293_vm4 = vcmp.gt.f32.partialorder %v203_v23, 0.0 }
 0x101   :  { %v332_v31 = vmul.f32 0.2, %v205_v26  ;;  %v209_v32 = vadd.f32 %v208_v30, %v1215_v4  ;;  %591 = vmatmul.mubr.bf16.vlgmr.msra.gmra.mrb[0].mxu1 %v403_v22  ;;  %vm294_vm5 = vcmp.gt.f32.partialorder %v205_v26, 0.0 }
 0x102   :  { %vm295_vm6 = vcmp.gt.f32.partialorder %v207_v29, 0.0  ;;  %v333_v33 = vmul.f32 0.2, %v207_v29  ;;  %v369_v35 = vsel %vm293_vm4, %v203_v23, %v331_v28 }
 0x103   :  { %vm296_vm7 = vcmp.gt.f32.partialorder %v209_v32, 0.0  ;;  %v334_v34 = vmul.f32 0.2, %v209_v32  ;;  %v370_v38 = vsel %vm294_vm5, %v205_v26, %v332_v31 }
 0x104   :  { %v371_v36 = vsel %vm295_vm6, %v207_v29, %v333_v33 }
 0x105   :  { %v212_v37 = vpop.f32.mrb[8].mxu0  ;;  %v372_v39 = vsel %vm296_vm7, %v209_v32, %v334_v34  ;;  %v405_v40 = vpack.c.bf16 %v371_v36, %v369_v35 }
 0x106   :  { %v213_v41 = vadd.f32 %v212_v37, %v1213_v3  ;;  %v214_v42 = vpop.f32.mrb[9].mxu0  ;;  %v406_v43 = vpack.c.bf16 %v372_v39, %v370_v38 }
 0x107   :  { %v215_v44 = vadd.f32 %v214_v42, %v1215_v4  ;;  %v216_v45 = vpop.f32.mrb[10].mxu0 }
 0x108   :  { %v335_v46 = vmul.f32 0.2, %v213_v41  ;;  %v217_v47 = vadd.f32 %v216_v45, %v1213_v3  ;;  %v218_v48 = vpop.f32.mrb[11].mxu0  ;;  %598 = vmatprep.mubr.bf16.mxu1 %v406_v43  ;;  %vm297_vm8 = vcmp.gt.f32.partialorder %v213_v41, 0.0 }
 0x109   :  { %v336_v49 = vmul.f32 0.2, %v215_v44  ;;  %v219_v50 = vadd.f32 %v218_v48, %v1215_v4  ;;  %599 = vmatmul.mubr.bf16.gmra.mrb[4].mxu1 %v405_v40  ;;  %vm298_vm9 = vcmp.gt.f32.partialorder %v215_v44, 0.0 }
 0x10a   :  { %vm299_vm10 = vcmp.gt.f32.partialorder %v217_v47, 0.0  ;;  %v337_v51 = vmul.f32 0.2, %v217_v47  ;;  %v373_v53 = vsel %vm297_vm8, %v213_v41, %v335_v46 }
 0x10b   :  { %vm300_vm11 = vcmp.gt.f32.partialorder %v219_v50, 0.0  ;;  %v338_v52 = vmul.f32 0.2, %v219_v50  ;;  %v374_v56 = vsel %vm298_vm9, %v215_v44, %v336_v49 }
 0x10c   :  { %v375_v54 = vsel %vm299_vm10, %v217_v47, %v337_v51 }
 0x10d   :  { %v222_v55 = vpop.f32.mrb[12].mxu0  ;;  %v376_v57 = vsel %vm300_vm11, %v219_v50, %v338_v52  ;;  %v407_v58 = vpack.c.bf16 %v375_v54, %v373_v53 }
 0x10e   :  { %v223_v59 = vadd.f32 %v222_v55, %v1213_v3  ;;  %v224_v60 = vpop.f32.mrb[13].mxu0  ;;  %v408_v61 = vpack.c.bf16 %v376_v57, %v374_v56 }
 0x10f   :  { %v225_v62 = vadd.f32 %v224_v60, %v1215_v4  ;;  %v226_v63 = vpop.f32.mrb[14].mxu0 }
 0x110   :  { %v339_v0 = vmul.f32 0.2, %v223_v59  ;;  %v227_v1 = vadd.f32 %v226_v63, %v1213_v3  ;;  %v228_v2 = vpop.f32.mrb[15].mxu0  ;;  %606 = vmatprep.mubr.bf16.mxu1 %v408_v61  ;;  %vm301_vm12 = vcmp.gt.f32.partialorder %v223_v59, 0.0 }
 0x111   :  { %v340_v5 = vmul.f32 0.2, %v225_v62  ;;  %v229_v6 = vadd.f32 %v228_v2, %v1215_v4  ;;  %607 = vmatmul.mubr.bf16.gmra.mrb[8].mxu1 %v407_v58  ;;  %vm302_vm13 = vcmp.gt.f32.partialorder %v225_v62, 0.0 }
 0x112   :  { %vm303_vm14 = vcmp.gt.f32.partialorder %v227_v1, 0.0  ;;  %v341_v7 = vmul.f32 0.2, %v227_v1  ;;  %v377_v9 = vsel %vm301_vm12, %v223_v59, %v339_v0 }
 0x113   :  { %vm304_vm15 = vcmp.gt.f32.partialorder %v229_v6, 0.0  ;;  %v342_v8 = vmul.f32 0.2, %v229_v6  ;;  %v378_v12 = vsel %vm302_vm13, %v225_v62, %v340_v5 }
 0x114   :  { %v379_v10 = vsel %vm303_vm14, %v227_v1, %v341_v7 }
 0x115   :  { %v232_v11 = vpop.f32.mrb[16].mxu0  ;;  %v380_v13 = vsel %vm304_vm15, %v229_v6, %v342_v8  ;;  %v409_v14 = vpack.c.bf16 %v379_v10, %v377_v9 }
 0x116   :  { %v233_v15 = vadd.f32 %v232_v11, %v1213_v3  ;;  %v234_v16 = vpop.f32.mrb[17].mxu0  ;;  %v410_v17 = vpack.c.bf16 %v380_v13, %v378_v12 }
 0x117   :  { %v235_v18 = vadd.f32 %v234_v16, %v1215_v4  ;;  %v236_v19 = vpop.f32.mrb[18].mxu0 }
 0x118   :  { %v343_v20 = vmul.f32 0.2, %v233_v15  ;;  %v237_v21 = vadd.f32 %v236_v19, %v1213_v3  ;;  %v238_v22 = vpop.f32.mrb[19].mxu0  ;;  %614 = vmatprep.mubr.bf16.mxu1 %v410_v17  ;;  %vm305_vm0 = vcmp.gt.f32.partialorder %v233_v15, 0.0 }
 0x119   :  { %v344_v23 = vmul.f32 0.2, %v235_v18  ;;  %v239_v24 = vadd.f32 %v238_v22, %v1215_v4  ;;  %615 = vmatmul.mubr.bf16.gmra.mrb[12].mxu1 %v409_v14  ;;  %vm306_vm1 = vcmp.gt.f32.partialorder %v235_v18, 0.0 }
 0x11a   :  { %vm307_vm2 = vcmp.gt.f32.partialorder %v237_v21, 0.0  ;;  %v345_v25 = vmul.f32 0.2, %v237_v21  ;;  %v381_v27 = vsel %vm305_vm0, %v233_v15, %v343_v20 }
 0x11b   :  { %vm308_vm3 = vcmp.gt.f32.partialorder %v239_v24, 0.0  ;;  %v346_v26 = vmul.f32 0.2, %v239_v24  ;;  %v382_v30 = vsel %vm306_vm1, %v235_v18, %v344_v23 }
 0x11c   :  { %v383_v28 = vsel %vm307_vm2, %v237_v21, %v345_v25 }
 0x11d   :  { %v242_v29 = vpop.f32.mrb[20].mxu0  ;;  %v384_v31 = vsel %vm308_vm3, %v239_v24, %v346_v26  ;;  %v411_v32 = vpack.c.bf16 %v383_v28, %v381_v27 }
 0x11e   :  { %v243_v33 = vadd.f32 %v242_v29, %v1213_v3  ;;  %v244_v34 = vpop.f32.mrb[21].mxu0  ;;  %v412_v35 = vpack.c.bf16 %v384_v31, %v382_v30 }
 0x11f   :  { %v245_v36 = vadd.f32 %v244_v34, %v1215_v4  ;;  %v246_v37 = vpop.f32.mrb[22].mxu0 }
 0x120   :  { %v347_v38 = vmul.f32 0.2, %v243_v33  ;;  %v247_v39 = vadd.f32 %v246_v37, %v1213_v3  ;;  %v248_v40 = vpop.f32.mrb[23].mxu0  ;;  %622 = vmatprep.mubr.bf16.mxu1 %v412_v35  ;;  %vm309_vm4 = vcmp.gt.f32.partialorder %v243_v33, 0.0 }
 0x121   :  { %v348_v41 = vmul.f32 0.2, %v245_v36  ;;  %v249_v42 = vadd.f32 %v248_v40, %v1215_v4  ;;  %623 = vmatmul.mubr.bf16.gmra.mrb[16].mxu1 %v411_v32  ;;  %vm310_vm5 = vcmp.gt.f32.partialorder %v245_v36, 0.0 }
 0x122   :  { %vm311_vm6 = vcmp.gt.f32.partialorder %v247_v39, 0.0  ;;  %v349_v43 = vmul.f32 0.2, %v247_v39  ;;  %v385_v45 = vsel %vm309_vm4, %v243_v33, %v347_v38 }
 0x123   :  { %vm312_vm7 = vcmp.gt.f32.partialorder %v249_v42, 0.0  ;;  %v350_v44 = vmul.f32 0.2, %v249_v42  ;;  %v386_v48 = vsel %vm310_vm5, %v245_v36, %v348_v41 }
 0x124   :  { %v387_v46 = vsel %vm311_vm6, %v247_v39, %v349_v43  ;;  %vm765_vm6 = vcmask 31744  }
 0x125   :  { %v252_v47 = vpop.f32.mrb[24].mxu0  ;;  %v388_v49 = vsel %vm312_vm7, %v249_v42, %v350_v44  ;;  %v413_v50 = vpack.c.bf16 %v387_v46, %v385_v45  ;;  %vm784_vm7 = vcmask 29696  }
 0x126   :  { %v253_v51 = vadd.f32 %v252_v47, %v1213_v3  ;;  %v254_v52 = vpop.f32.mrb[25].mxu0  ;;  %v414_v53 = vpack.c.bf16 %v388_v49, %v386_v48 }
 0x127   :  { %v255_v54 = vadd.f32 %v254_v52, %v1215_v4  ;;  %v256_v55 = vpop.f32.mrb[26].mxu0 }
 0x128   :  { %v351_v56 = vmul.f32 0.2, %v253_v51  ;;  %v257_v57 = vadd.f32 %v256_v55, %v1213_v3  ;;  %v258_v58 = vpop.f32.mrb[27].mxu0  ;;  %630 = vmatprep.mubr.bf16.mxu1 %v414_v53  ;;  %vm313_vm8 = vcmp.gt.f32.partialorder %v253_v51, 0.0 }
 0x129   :  { %v352_v59 = vmul.f32 0.2, %v255_v54  ;;  %v259_v60 = vadd.f32 %v258_v58, %v1215_v4  ;;  %631 = vmatmul.mubr.bf16.gmra.mrb[20].mxu1 %v413_v50  ;;  %vm314_vm9 = vcmp.gt.f32.partialorder %v255_v54, 0.0 }
 0x12a   :  { %vm315_vm10 = vcmp.gt.f32.partialorder %v257_v57, 0.0  ;;  %v353_v61 = vmul.f32 0.2, %v257_v57  ;;  %v389_v63 = vsel %vm313_vm8, %v253_v51, %v351_v56 }
 0x12b   :  { %vm316_vm11 = vcmp.gt.f32.partialorder %v259_v60, 0.0  ;;  %v354_v62 = vmul.f32 0.2, %v259_v60  ;;  %v390_v2 = vsel %vm314_vm9, %v255_v54, %v352_v59 }
 0x12c   :  { %v391_v0 = vsel %vm315_vm10, %v257_v57, %v353_v61 }
 0x12d   :  { %v262_v1 = vpop.f32.mrb[28].mxu0  ;;  %v392_v5 = vsel %vm316_vm11, %v259_v60, %v354_v62  ;;  %v415_v6 = vpack.c.bf16 %v391_v0, %v389_v63 }
 0x12e   :  { %v263_v7 = vadd.f32 %v262_v1, %v1213_v3  ;;  %v264_v8 = vpop.f32.mrb[29].mxu0  ;;  %v416_v9 = vpack.c.bf16 %v392_v5, %v390_v2 }
 0x12f   :  { %v265_v10 = vadd.f32 %v264_v8, %v1215_v4  ;;  %v266_v11 = vpop.f32.mrb[30].mxu0 }
 0x130   :  { %v355_v12 = vmul.f32 0.2, %v263_v7  ;;  %v267_v13 = vadd.f32 %v266_v11, %v1213_v3  ;;  %v268_v14 = vpop.f32.mrb[31].mxu0  ;;  %638 = vmatprep.mubr.bf16.mxu1 %v416_v9  ;;  %vm317_vm12 = vcmp.gt.f32.partialorder %v263_v7, 0.0 }
 0x131   :  { %v356_v15 = vmul.f32 0.2, %v265_v10  ;;  %v269_v16 = vadd.f32 %v268_v14, %v1215_v4  ;;  %639 = vmatmul.mubr.bf16.gmra.mrb[24].mxu1 %v415_v6  ;;  %vm318_vm13 = vcmp.gt.f32.partialorder %v265_v10, 0.0 }
 0x132   :  { %vm319_vm14 = vcmp.gt.f32.partialorder %v267_v13, 0.0  ;;  %v357_v17 = vmul.f32 0.2, %v267_v13  ;;  %v393_v19 = vsel %vm317_vm12, %v263_v7, %v355_v12 }
 0x133   :  { %vm320_vm15 = vcmp.gt.f32.partialorder %v269_v16, 0.0  ;;  %v358_v18 = vmul.f32 0.2, %v269_v16  ;;  %v394_v22 = vsel %vm318_vm13, %v265_v10, %v356_v15 }
 0x134   :  { %v395_v20 = vsel %vm319_vm14, %v267_v13, %v357_v17 }
 0x135   :  { %v272_v21 = vpop.f32.mrb[32].mxu0  ;;  %v396_v23 = vsel %vm320_vm15, %v269_v16, %v358_v18  ;;  %v417_v24 = vpack.c.bf16 %v395_v20, %v393_v19 }
 0x136   :  { %v273_v25 = vadd.f32 %v272_v21, %v1213_v3  ;;  %v274_v26 = vpop.f32.mrb[33].mxu0  ;;  %v418_v27 = vpack.c.bf16 %v396_v23, %v394_v22 }
 0x137   :  { %v275_v28 = vadd.f32 %v274_v26, %v1215_v4  ;;  %v276_v29 = vpop.f32.mrb[34].mxu0 }
 0x138   :  { %v359_v30 = vmul.f32 0.2, %v273_v25  ;;  %v277_v31 = vadd.f32 %v276_v29, %v1213_v3  ;;  %v278_v32 = vpop.f32.mrb[35].mxu0  ;;  %646 = vmatprep.mubr.bf16.mxu1 %v418_v27  ;;  %vm321_vm0 = vcmp.gt.f32.partialorder %v273_v25, 0.0 }
 0x139   :  { %v360_v33 = vmul.f32 0.2, %v275_v28  ;;  %v279_v34 = vadd.f32 %v278_v32, %v1215_v4  ;;  %647 = vmatmul.mubr.bf16.gmra.mrb[28].mxu1 %v417_v24  ;;  %vm322_vm1 = vcmp.gt.f32.partialorder %v275_v28, 0.0 }
 0x13a   :  { %vm323_vm2 = vcmp.gt.f32.partialorder %v277_v31, 0.0  ;;  %v361_v35 = vmul.f32 0.2, %v277_v31  ;;  %v397_v37 = vsel %vm321_vm0, %v273_v25, %v359_v30 }
 0x13b   :  { %vm324_vm3 = vcmp.gt.f32.partialorder %v279_v34, 0.0  ;;  %v362_v36 = vmul.f32 0.2, %v279_v34  ;;  %v398_v40 = vsel %vm322_vm1, %v275_v28, %v360_v33 }
 0x13c   :  { %v399_v38 = vsel %vm323_vm2, %v277_v31, %v361_v35 }
 0x13d   :  { %v282_v39 = vpop.f32.mrb[36].mxu0  ;;  %v400_v41 = vsel %vm324_vm3, %v279_v34, %v362_v36  ;;  %v419_v42 = vpack.c.bf16 %v399_v38, %v397_v37 }
 0x13e   :  { %v283_v43 = vadd.f32 %v282_v39, %v1213_v3  ;;  %v284_v44 = vpop.f32.mrb[37].mxu0  ;;  %v420_v45 = vpack.c.bf16 %v400_v41, %v398_v40  ;;  %v1258_v3 = vld [vmem:[%s1358_s4] ss:$0 sm:$0xff] }
 0x13f   :  { %v285_v46 = vadd.f32 %v284_v44, %v1215_v4  ;;  %v286_v47 = vpop.f32.mrb[38].mxu0 }
 0x140   :  { %v363_v48 = vmul.f32 0.2, %v283_v43  ;;  %v287_v49 = vpop.f32.mrb[39].mxu0  ;;  %654 = vmatprep.mubr.bf16.mxu1 %v420_v45  ;;  %vm325_vm4 = vcmp.gt.f32.partialorder %v283_v43, 0.0 }
 0x141   :  { %vm326_vm5 = vcmp.gt.f32.partialorder %v285_v46, 0.0  ;;  %v364_v50 = vmul.f32 0.2, %v285_v46  ;;  %655 = vmatmul.mubr.bf16.gmra.mrb[32].mxu1 %v419_v42 }
 0x142   :  { %v401_v53 = vsel %vm325_vm4, %v283_v43, %v363_v48 }
 0x143   :  { %v402_v51 = vsel %vm326_vm5, %v285_v46, %v364_v50  ;;  %v421_v54 = vpack.c.bf16 %v401_v53, %v401_v53 }
 0x144   :  { %v422_v52 = vpack.c.bf16 %v402_v51, %v402_v51 }
 0x146   :  { %662 = vmatprep.mubr.bf16.mxu1 %v422_v52 }
 0x149   :  { %663 = vmatmul.mubr.bf16.gmra.mrb[36].mxu1 %v421_v54 }
 0x1d4   :  { %v839_v55 = vpop.f32.mrb[0].mxu1 }
 0x1d5   :  { %v840_v4 = vpop.f32.mrb[1].mxu1 }
 0x1d6   :  { %v841_v56 = vadd.f32 %v840_v4, %v839_v55  ;;  %v842_v57 = vpop.f32.mrb[2].mxu1 }
 0x1d7   :  { %v843_v58 = vpop.f32.mrb[3].mxu1 }
 0x1d8   :  { %v593_v59 = vadd.f32 %v841_v56, %v1258_v3  ;;  %v844_v60 = vadd.f32 %v843_v58, %v842_v57 }
 0x1da   :  { %v670_v61 = vsub.f32 0.0, %v593_v59  ;;  %v596_v62 = vadd.f32 %v844_v60, %v1258_v3 }
 0x1dc   :  { %v689_v63 = vmul.f32 1.442695, %v670_v61  ;;  %v671_v0 = vsub.f32 0.0, %v596_v62  ;;  %v845_v1 = vpop.f32.mrb[4].mxu1 }
 0x1dd   :  { %v846_v2 = vpop.f32.mrb[5].mxu1 }
 0x1de   :  { %940 = vpow2.f32 %v689_v63  ;;  %v691_v5 = vmul.f32 1.442695, %v671_v0  ;;  %v847_v6 = vadd.f32 %v846_v2, %v845_v1  ;;  %v848_v7 = vpop.f32.mrb[6].mxu1 }
 0x1df   :  { %v849_v8 = vpop.f32.mrb[7].mxu1 }
 0x1e0   :  { %942 = vpow2.f32 %v691_v5  ;;  %v601_v9 = vadd.f32 %v847_v6, %v1258_v3  ;;  %v850_v10 = vadd.f32 %v849_v8, %v848_v7 }
 0x1e2   :  { %v672_v11 = vsub.f32 0.0, %v601_v9  ;;  %v604_v12 = vadd.f32 %v850_v10, %v1258_v3 }
 0x1e4   :  { %v693_v13 = vmul.f32 1.442695, %v672_v11  ;;  %v673_v14 = vsub.f32 0.0, %v604_v12  ;;  %v851_v15 = vpop.f32.mrb[8].mxu1 }
 0x1e5   :  { %v852_v16 = vpop.f32.mrb[9].mxu1 }
 0x1e6   :  { %944 = vpow2.f32 %v693_v13  ;;  %v695_v17 = vmul.f32 1.442695, %v673_v14  ;;  %v853_v18 = vadd.f32 %v852_v16, %v851_v15  ;;  %v854_v19 = vpop.f32.mrb[10].mxu1 }
 0x1e7   :  { %v855_v20 = vpop.f32.mrb[11].mxu1 }
 0x1e8   :  { %v941_v21 = vpop.eup %940  ;;  %946 = vpow2.f32 %v695_v17  ;;  %v609_v22 = vadd.f32 %v853_v18, %v1258_v3  ;;  %v856_v23 = vadd.f32 %v855_v20, %v854_v19 }
 0x1e9   :  { %v727_v24 = vadd.f32 1.0, %v941_v21 }
 0x1ea   :  { %v943_v25 = vpop.eup %942  ;;  %v674_v26 = vsub.f32 0.0, %v609_v22  ;;  %v612_v27 = vadd.f32 %v856_v23, %v1258_v3 }
 0x1eb   :  { %948 = vrcp.f32 %v727_v24  ;;  %v728_v28 = vadd.f32 1.0, %v943_v25 }
 0x1ec   :  { %v697_v29 = vmul.f32 1.442695, %v674_v26  ;;  %v675_v30 = vsub.f32 0.0, %v612_v27  ;;  %v857_v31 = vpop.f32.mrb[12].mxu1 }
 0x1ed   :  { %950 = vrcp.f32 %v728_v28  ;;  %v858_v32 = vpop.f32.mrb[13].mxu1 }
 0x1ee   :  { %952 = vpow2.f32 %v697_v29  ;;  %v699_v33 = vmul.f32 1.442695, %v675_v30  ;;  %v859_v34 = vadd.f32 %v858_v32, %v857_v31  ;;  %v860_v35 = vpop.f32.mrb[14].mxu1 }
 0x1ef   :  { %v861_v36 = vpop.f32.mrb[15].mxu1 }
 0x1f0   :  { %v945_v37 = vpop.eup %944  ;;  %954 = vpow2.f32 %v699_v33  ;;  %v617_v38 = vadd.f32 %v859_v34, %v1258_v3  ;;  %v862_v39 = vadd.f32 %v861_v36, %v860_v35 }
 0x1f1   :  { %v729_v40 = vadd.f32 1.0, %v945_v37 }
 0x1f2   :  { %v947_v41 = vpop.eup %946  ;;  %v676_v42 = vsub.f32 0.0, %v617_v38  ;;  %v620_v43 = vadd.f32 %v862_v39, %v1258_v3 }
 0x1f3   :  { %956 = vrcp.f32 %v729_v40  ;;  %v730_v44 = vadd.f32 1.0, %v947_v41 }
 0x1f4   :  { %v701_v45 = vmul.f32 1.442695, %v676_v42  ;;  %v677_v46 = vsub.f32 0.0, %v620_v43  ;;  %v863_v47 = vpop.f32.mrb[16].mxu1 }
 0x1f5   :  { %v949_v48 = vpop.eup %948  ;;  %958 = vrcp.f32 %v730_v44  ;;  %v864_v49 = vpop.f32.mrb[17].mxu1 }
 0x1f6   :  { %766 = vst.msk [vmem:[%s1359_s5] sm:$0xff] %vm765_vm6, %v949_v48  ;;  %960 = vpow2.f32 %v701_v45  ;;  %v703_v50 = vmul.f32 1.442695, %v677_v46  ;;  %v865_v51 = vadd.f32 %v864_v49, %v863_v47  ;;  %v866_v52 = vpop.f32.mrb[18].mxu1 }
 0x1f7   :  { %v951_v53 = vpop.eup %950  ;;  %v867_v54 = vpop.f32.mrb[19].mxu1 }
 0x1f8   :  { %v953_v55 = vpop.eup %952  ;;  %767 = vst.msk [vmem:[%s1359_s5 + $0x8] sm:$0xff] %vm765_vm6, %v951_v53  ;;  %962 = vpow2.f32 %v703_v50  ;;  %v625_v4 = vadd.f32 %v865_v51, %v1258_v3  ;;  %v868_v56 = vadd.f32 %v867_v54, %v866_v52 }
 0x1f9   :  { %v731_v57 = vadd.f32 1.0, %v953_v55 }
 0x1fa   :  { %v955_v58 = vpop.eup %954  ;;  %v678_v59 = vsub.f32 0.0, %v625_v4  ;;  %v628_v60 = vadd.f32 %v868_v56, %v1258_v3 }
 0x1fb   :  { %964 = vrcp.f32 %v731_v57  ;;  %v732_v61 = vadd.f32 1.0, %v955_v58 }
 0x1fc   :  { %v705_v62 = vmul.f32 1.442695, %v678_v59  ;;  %v679_v63 = vsub.f32 0.0, %v628_v60  ;;  %v869_v0 = vpop.f32.mrb[20].mxu1 }
 0x1fd   :  { %v957_v1 = vpop.eup %956  ;;  %966 = vrcp.f32 %v732_v61  ;;  %v870_v2 = vpop.f32.mrb[21].mxu1 }
 0x1fe   :  { %768 = vst.msk [vmem:[%s1359_s5 + $0x10] sm:$0xff] %vm765_vm6, %v957_v1  ;;  %968 = vpow2.f32 %v705_v62  ;;  %v707_v5 = vmul.f32 1.442695, %v679_v63  ;;  %v871_v6 = vadd.f32 %v870_v2, %v869_v0  ;;  %v872_v7 = vpop.f32.mrb[22].mxu1 }
 0x1ff   :  { %v959_v8 = vpop.eup %958  ;;  %v873_v9 = vpop.f32.mrb[23].mxu1 }
 0x200   :  { %v961_v10 = vpop.eup %960  ;;  %769 = vst.msk [vmem:[%s1359_s5 + $0x18] sm:$0xff] %vm765_vm6, %v959_v8  ;;  %970 = vpow2.f32 %v707_v5  ;;  %v633_v11 = vadd.f32 %v871_v6, %v1258_v3  ;;  %v874_v12 = vadd.f32 %v873_v9, %v872_v7 }
 0x201   :  { %v733_v13 = vadd.f32 1.0, %v961_v10 }
 0x202   :  { %v963_v14 = vpop.eup %962  ;;  %v680_v15 = vsub.f32 0.0, %v633_v11  ;;  %v636_v16 = vadd.f32 %v874_v12, %v1258_v3 }
 0x203   :  { %972 = vrcp.f32 %v733_v13  ;;  %v734_v17 = vadd.f32 1.0, %v963_v14 }
 0x204   :  { %v709_v18 = vmul.f32 1.442695, %v680_v15  ;;  %v681_v19 = vsub.f32 0.0, %v636_v16  ;;  %v875_v20 = vpop.f32.mrb[24].mxu1 }
 0x205   :  { %v965_v21 = vpop.eup %964  ;;  %974 = vrcp.f32 %v734_v17  ;;  %v876_v22 = vpop.f32.mrb[25].mxu1 }
 0x206   :  { %770 = vst.msk [vmem:[%s1359_s5 + $0x20] sm:$0xff] %vm765_vm6, %v965_v21  ;;  %976 = vpow2.f32 %v709_v18  ;;  %v711_v23 = vmul.f32 1.442695, %v681_v19  ;;  %v877_v24 = vadd.f32 %v876_v22, %v875_v20  ;;  %v878_v25 = vpop.f32.mrb[26].mxu1 }
 0x207   :  { %v967_v26 = vpop.eup %966  ;;  %v879_v27 = vpop.f32.mrb[27].mxu1 }
 0x208   :  { %v969_v28 = vpop.eup %968  ;;  %771 = vst.msk [vmem:[%s1359_s5 + $0x28] sm:$0xff] %vm765_vm6, %v967_v26  ;;  %978 = vpow2.f32 %v711_v23  ;;  %v641_v29 = vadd.f32 %v877_v24, %v1258_v3  ;;  %v880_v30 = vadd.f32 %v879_v27, %v878_v25 }
 0x209   :  { %v735_v31 = vadd.f32 1.0, %v969_v28 }
 0x20a   :  { %v971_v32 = vpop.eup %970  ;;  %v682_v33 = vsub.f32 0.0, %v641_v29  ;;  %v644_v34 = vadd.f32 %v880_v30, %v1258_v3 }
 0x20b   :  { %980 = vrcp.f32 %v735_v31  ;;  %v736_v35 = vadd.f32 1.0, %v971_v32 }
 0x20c   :  { %v713_v36 = vmul.f32 1.442695, %v682_v33  ;;  %v683_v37 = vsub.f32 0.0, %v644_v34  ;;  %v881_v38 = vpop.f32.mrb[28].mxu1 }
 0x20d   :  { %v973_v39 = vpop.eup %972  ;;  %982 = vrcp.f32 %v736_v35  ;;  %v882_v40 = vpop.f32.mrb[29].mxu1 }
 0x20e   :  { %772 = vst.msk [vmem:[%s1359_s5 + $0x30] sm:$0xff] %vm765_vm6, %v973_v39  ;;  %984 = vpow2.f32 %v713_v36  ;;  %v715_v41 = vmul.f32 1.442695, %v683_v37  ;;  %v883_v42 = vadd.f32 %v882_v40, %v881_v38  ;;  %v884_v43 = vpop.f32.mrb[30].mxu1 }
 0x20f   :  { %v975_v44 = vpop.eup %974  ;;  %v885_v45 = vpop.f32.mrb[31].mxu1 }
 0x210   :  { %v977_v46 = vpop.eup %976  ;;  %773 = vst.msk [vmem:[%s1359_s5 + $0x38] sm:$0xff] %vm765_vm6, %v975_v44  ;;  %986 = vpow2.f32 %v715_v41  ;;  %v649_v47 = vadd.f32 %v883_v42, %v1258_v3  ;;  %v886_v48 = vadd.f32 %v885_v45, %v884_v43 }
 0x211   :  { %v737_v49 = vadd.f32 1.0, %v977_v46 }
 0x212   :  { %v979_v50 = vpop.eup %978  ;;  %v684_v51 = vsub.f32 0.0, %v649_v47  ;;  %v652_v52 = vadd.f32 %v886_v48, %v1258_v3 }
 0x213   :  { %988 = vrcp.f32 %v737_v49  ;;  %v738_v53 = vadd.f32 1.0, %v979_v50 }
 0x214   :  { %v717_v54 = vmul.f32 1.442695, %v684_v51  ;;  %v685_v55 = vsub.f32 0.0, %v652_v52  ;;  %v887_v4 = vpop.f32.mrb[32].mxu1 }
 0x215   :  { %v981_v56 = vpop.eup %980  ;;  %990 = vrcp.f32 %v738_v53  ;;  %v888_v57 = vpop.f32.mrb[33].mxu1 }
 0x216   :  { %774 = vst.msk [vmem:[%s1359_s5 + $0x40] sm:$0xff] %vm765_vm6, %v981_v56  ;;  %992 = vpow2.f32 %v717_v54  ;;  %v719_v58 = vmul.f32 1.442695, %v685_v55  ;;  %v889_v59 = vadd.f32 %v888_v57, %v887_v4  ;;  %v890_v60 = vpop.f32.mrb[34].mxu1 }
 0x217   :  { %v983_v61 = vpop.eup %982  ;;  %v891_v62 = vpop.f32.mrb[35].mxu1 }
 0x218   :  { %v985_v63 = vpop.eup %984  ;;  %775 = vst.msk [vmem:[%s1359_s5 + $0x48] sm:$0xff] %vm765_vm6, %v983_v61  ;;  %994 = vpow2.f32 %v719_v58  ;;  %v657_v0 = vadd.f32 %v889_v59, %v1258_v3  ;;  %v892_v1 = vadd.f32 %v891_v62, %v890_v60 }
 0x219   :  { %v739_v2 = vadd.f32 1.0, %v985_v63 }
 0x21a   :  { %v987_v5 = vpop.eup %986  ;;  %v686_v6 = vsub.f32 0.0, %v657_v0  ;;  %v660_v7 = vadd.f32 %v892_v1, %v1258_v3 }
 0x21b   :  { %996 = vrcp.f32 %v739_v2  ;;  %v740_v8 = vadd.f32 1.0, %v987_v5 }
 0x21c   :  { %v721_v9 = vmul.f32 1.442695, %v686_v6  ;;  %v687_v10 = vsub.f32 0.0, %v660_v7  ;;  %v893_v11 = vpop.f32.mrb[36].mxu1 }
 0x21d   :  { %v989_v12 = vpop.eup %988  ;;  %998 = vrcp.f32 %v740_v8  ;;  %v894_v13 = vpop.f32.mrb[37].mxu1 }
 0x21e   :  { %776 = vst.msk [vmem:[%s1359_s5 + $0x50] sm:$0xff] %vm765_vm6, %v989_v12  ;;  %1000 = vpow2.f32 %v721_v9  ;;  %v723_v14 = vmul.f32 1.442695, %v687_v10  ;;  %v895_v15 = vadd.f32 %v894_v13, %v893_v11  ;;  %v896_v16 = vpop.f32.mrb[38].mxu1 }
 0x21f   :  { %v991_v17 = vpop.eup %990  ;;  %v897_v18 = vpop.f32.mrb[39].mxu1 }
 0x220   :  { %v993_v19 = vpop.eup %992  ;;  %777 = vst.msk [vmem:[%s1359_s5 + $0x58] sm:$0xff] %vm765_vm6, %v991_v17  ;;  %1002 = vpow2.f32 %v723_v14  ;;  %v665_v20 = vadd.f32 %v895_v15, %v1258_v3 }
 0x221   :  { %v741_v21 = vadd.f32 1.0, %v993_v19 }
 0x222   :  { %v995_v22 = vpop.eup %994  ;;  %v688_v23 = vsub.f32 0.0, %v665_v20 }
 0x223   :  { %1004 = vrcp.f32 %v741_v21  ;;  %v742_v24 = vadd.f32 1.0, %v995_v22 }
 0x224   :  { %v725_v25 = vmul.f32 1.442695, %v688_v23 }
 0x225   :  { %v997_v26 = vpop.eup %996  ;;  %1006 = vrcp.f32 %v742_v24 }
 0x226   :  { %778 = vst.msk [vmem:[%s1359_s5 + $0x60] sm:$0xff] %vm765_vm6, %v997_v26  ;;  %1008 = vpow2.f32 %v725_v25 }
 0x227   :  { %v999_v27 = vpop.eup %998 }
 0x228   :  { %v1001_v28 = vpop.eup %1000  ;;  %779 = vst.msk [vmem:[%s1359_s5 + $0x68] sm:$0xff] %vm765_vm6, %v999_v27 }
 0x229   :  { %v743_v3 = vadd.f32 1.0, %v1001_v28 }
 0x22a   :  { %v1003_v29 = vpop.eup %1002 }
 0x22b   :  { %1010 = vrcp.f32 %v743_v3  ;;  %v744_v30 = vadd.f32 1.0, %v1003_v29 }
 0x22d   :  { %v1005_v31 = vpop.eup %1004  ;;  %1012 = vrcp.f32 %v744_v30 }
 0x22e   :  { %780 = vst.msk [vmem:[%s1359_s5 + $0x70] sm:$0xff] %vm765_vm6, %v1005_v31 }
 0x22f   :  { %v1007_v32 = vpop.eup %1006 }
 0x230   :  { %v1009_v33 = vpop.eup %1008  ;;  %781 = vst.msk [vmem:[%s1359_s5 + $0x78] sm:$0xff] %vm765_vm6, %v1007_v32 }
 0x231   :  { %v745_v34 = vadd.f32 1.0, %v1009_v33 }
 0x233   :  { %1014 = vrcp.f32 %v745_v34 }
 0x235   :  { %v1011_v35 = vpop.eup %1010 }
 0x236   :  { %782 = vst.msk [vmem:[%s1359_s5 + $0x80] sm:$0xff] %vm765_vm6, %v1011_v35 }
 0x237   :  { %v1013_v36 = vpop.eup %1012 }
 0x238   :  { %783 = vst.msk [vmem:[%s1359_s5 + $0x88] sm:$0xff] %vm765_vm6, %v1013_v36 }
 0x23d   :  { %v1015_v37 = vpop.eup %1014 }
 0x23e   :  { %785 = vst.msk [vmem:[%s1359_s5 + $0x90] sm:$0x3f] %vm784_vm7, %v1015_v37 }

</bundles_post_ra>
